<compile_context>
chip_gen: v5e
topology: v5e:2x2
jax: 0.10.0
libtpu: 0.0.40
codegen_flags: <defaults>
</compile_context>

<pallas_src>
import functools

import jax
import jax.numpy as jnp
from jax.experimental import pallas as pl
from jax.experimental.pallas import tpu as pltpu

_LANE = 128          # lane width: output padded to this so stores are unmasked
_DEFAULT_TILE_M = 512  # multiple of 256 (v6e/v7x MXU height) and 128 (v5e MXU height)


def _round_up(x, m):
    return ((x + m - 1) // m) * m


def _mlp_kernel(x_ref, w1_ref, b1_ref, w2_ref, b2_ref, o_ref):
    # Linear(20->256) -> ReLU -> Linear(256->128 padded), fully fused in VMEM.
    # Both matmuls accumulate in f32 on the MXU; ReLU runs on the VPU in f32
    # (no bf16 VPU ops, safe on v5e as well).
    x = x_ref[...]
    h = jnp.dot(x, w1_ref[...], preferred_element_type=jnp.float32) + b1_ref[...]
    h = jnp.maximum(h, 0.0)                                   # nn.ReLU()
    y = jnp.dot(h, w2_ref[...], preferred_element_type=jnp.float32) + b2_ref[...]
    o_ref[...] = y.astype(o_ref.dtype)


@functools.partial(jax.jit, static_argnames=("tile_m",))
def my_sequential(x, w1, b1, w2, b2, *, tile_m=_DEFAULT_TILE_M):
    """Pallas forward of MySequential(Linear(20,256), ReLU, Linear(256,10)).

    - Grid over the batch dimension: x / output are tiled (tile_m rows per grid
      step, double-buffered by Pallas); w1/b1/w2/b2 use constant index_maps so
      they stay resident in VMEM across all grid steps.
    - Output (and w2/b2) are zero-padded to 128 lanes so the output tile is
      lane-dense (full unmasked stores); the wrapper slices back to [:, :out].
    - Batch axis marked "parallel" so v7x can shard grid steps across its two
      TensorCores (harmless on v5e/v6e).
    """
    batch, in_dim = x.shape
    hidden, out_dim = w2.shape
    dtype = x.dtype

    # ---- lane-dense output padding (zeros, sliced off afterwards) ----------
    out_pad = _round_up(out_dim, _LANE)
    w2p = jnp.zeros((hidden, out_pad), w2.dtype).at[:, :out_dim].set(w2)
    b2p = jnp.zeros((1, out_pad), b2.dtype).at[:, :out_dim].set(b2)

    # ---- batch tiling: tile_m multiple of 8 (sublane), clipped for tiny batch
    tm = min(tile_m, _round_up(batch, 8))
    tm = _round_up(tm, 8)
    padded_batch = _round_up(batch, tm)
    if padded_batch != batch:
        x = jnp.pad(x, ((0, padded_batch - batch), (0, 0)))
    grid = (padded_batch // tm,)

    # ---- cost hint for the XLA scheduler ------------------------------------
    itemsize = jnp.dtype(dtype).itemsize
    cost = pl.CostEstimate(
        flops=2 * padded_batch * (in_dim * hidden + hidden * out_pad),
        transcendentals=0,
        bytes_accessed=(
            padded_batch * (in_dim + out_pad) * itemsize
            + (in_dim * hidden + hidden + hidden * out_pad + out_pad) * itemsize
        ),
    )

    out_padded = pl.pallas_call(
        _mlp_kernel,
        out_shape=jax.ShapeDtypeStruct((padded_batch, out_pad), dtype),
        grid=grid,
        in_specs=[
            pl.BlockSpec((tm, in_dim), lambda i: (i, 0)),       # x: tiled over batch
            pl.BlockSpec((in_dim, hidden), lambda i: (0, 0)),   # w1: resident
            pl.BlockSpec((1, hidden), lambda i: (0, 0)),        # b1: resident
            pl.BlockSpec((hidden, out_pad), lambda i: (0, 0)),  # w2 (padded): resident
            pl.BlockSpec((1, out_pad), lambda i: (0, 0)),       # b2 (padded): resident
        ],
        out_specs=pl.BlockSpec((tm, out_pad), lambda i: (i, 0)),
        compiler_params=pltpu.CompilerParams(
            dimension_semantics=("parallel",),
        ),
        cost_estimate=cost,
    )(x, w1, b1, w2p, b2p)

    # slice off the batch padding and the 118 zero lane-padding columns
    return out_padded[:batch, :out_dim]


def init_params(key, in_dim=20, hidden=256, out_dim=10, dtype=jnp.float32):
    """Deterministic params, mimicking PyTorch nn.Linear default init
    (uniform in ±1/sqrt(fan_in))."""
    k1, k2, k3, k4 = jax.random.split(key, 4)
    lim1 = 1.0 / jnp.sqrt(jnp.float32(in_dim))
    lim2 = 1.0 / jnp.sqrt(jnp.float32(hidden))
    w1 = jax.random.uniform(k1, (in_dim, hidden), dtype, -lim1, lim1)
    b1 = jax.random.uniform(k2, (1, hidden), dtype, -lim1, lim1)
    w2 = jax.random.uniform(k3, (hidden, out_dim), dtype, -lim2, lim2)
    b2 = jax.random.uniform(k4, (1, out_dim), dtype, -lim2, lim2)
    return w1, b1, w2, b2


if __name__ == "__main__":
    key = jax.random.PRNGKey(0)
    kx, kp = jax.random.split(key)

    # X = torch.rand(2, 20)  -> uniform [0, 1), shape (2, 20)
    x = jax.random.uniform(kx, (2, 20), jnp.float32)
    w1, b1, w2, b2 = init_params(kp)

    out = my_sequential(x, w1, b1, w2, b2)
    out = jax.block_until_ready(out)

    # reference check in plain JAX (same math, same params)
    ref = jnp.maximum(x @ w1 + b1, 0.0) @ w2 + b2
    assert out.shape == (2, 10), out.shape
    assert jnp.allclose(out, ref, atol=1e-5, rtol=1e-5)

    # also exercise a realistic batch that actually uses the grid (2 tiles)
    xb = jax.random.uniform(kx, (1024, 20), jnp.float32)
    outb = jax.block_until_ready(my_sequential(xb, w1, b1, w2, b2))
    refb = jnp.maximum(xb @ w1 + b1, 0.0) @ w2 + b2
    assert outb.shape == (1024, 10)
    assert jnp.allclose(outb, refb, atol=1e-4, rtol=1e-4)

    print("KERNEL_OK")
</pallas_src>

<mosaic_0001>
module attributes {stable_mosaic.version = 11 : i64} {
  func.func @_mlp_kernel(%arg0: i32, %arg1: memref<8x20xf32, #tpu.memory_space<vmem>>, %arg2: memref<20x256xf32, #tpu.memory_space<vmem>>, %arg3: memref<1x256xf32, #tpu.memory_space<vmem>>, %arg4: memref<256x128xf32, #tpu.memory_space<vmem>>, %arg5: memref<1x128xf32, #tpu.memory_space<vmem>>, %arg6: memref<8x128xf32, #tpu.memory_space<vmem>>) attributes {dimension_semantics = [#tpu.dimension_semantics<parallel>], iteration_bounds = array<i64: 1>, scalar_prefetch = 0 : i64, scratch_operands = 0 : i64, tpu.core_type = #tpu.core_type<tc>, window_params = [{transform_indices = @transform_0, window_bounds = array<i64: 8, 20>}, {pipeline_mode = #tpu.pipeline_mode<synchronous>, transform_indices = @transform_1, window_bounds = array<i64: 20, 256>}, {pipeline_mode = #tpu.pipeline_mode<synchronous>, transform_indices = @transform_2, window_bounds = array<i64: 1, 256>}, {pipeline_mode = #tpu.pipeline_mode<synchronous>, transform_indices = @transform_3, window_bounds = array<i64: 256, 128>}, {pipeline_mode = #tpu.pipeline_mode<synchronous>, transform_indices = @transform_4, window_bounds = array<i64: 1, 128>}, {transform_indices = @transform_5, window_bounds = array<i64: 8, 128>}]} {
    %c0 = arith.constant 0 : index
    %c0_0 = arith.constant 0 : index
    %0 = vector.load %arg1[%c0, %c0_0] : memref<8x20xf32, #tpu.memory_space<vmem>>, vector<8x20xf32>
    %c0_1 = arith.constant 0 : index
    %c0_2 = arith.constant 0 : index
    %1 = vector.load %arg2[%c0_1, %c0_2] : memref<20x256xf32, #tpu.memory_space<vmem>>, vector<20x256xf32>
    %cst = arith.constant dense<0.000000e+00> : vector<8x256xf32>
    %2 = tpu.matmul %0, %1, %cst {dimension_numbers = #tpu.dot_dimension_numbers<[1], [0], [0], [1], [0, 0, 1, 1], [], []>} : vector<8x20xf32>, vector<20x256xf32>, vector<8x256xf32> -> vector<8x256xf32>
    %c0_3 = arith.constant 0 : index
    %c0_4 = arith.constant 0 : index
    %3 = vector.load %arg3[%c0_3, %c0_4] : memref<1x256xf32, #tpu.memory_space<vmem>>, vector<1x256xf32>
    %4 = vector.broadcast %3 : vector<1x256xf32> to vector<8x256xf32>
    %5 = arith.addf %2, %4 : vector<8x256xf32>
    %cst_5 = arith.constant 0.000000e+00 : f32
    %6 = vector.broadcast %cst_5 : f32 to vector<8x256xf32>
    %7 = arith.maximumf %5, %6 : vector<8x256xf32>
    %c0_6 = arith.constant 0 : index
    %c0_7 = arith.constant 0 : index
    %8 = vector.load %arg4[%c0_6, %c0_7] : memref<256x128xf32, #tpu.memory_space<vmem>>, vector<256x128xf32>
    %cst_8 = arith.constant dense<0.000000e+00> : vector<8x128xf32>
    %9 = tpu.matmul %7, %8, %cst_8 {dimension_numbers = #tpu.dot_dimension_numbers<[1], [0], [0], [1], [0, 0, 1, 1], [], []>} : vector<8x256xf32>, vector<256x128xf32>, vector<8x128xf32> -> vector<8x128xf32>
    %c0_9 = arith.constant 0 : index
    %c0_10 = arith.constant 0 : index
    %10 = vector.load %arg5[%c0_9, %c0_10] : memref<1x128xf32, #tpu.memory_space<vmem>>, vector<1x128xf32>
    %11 = vector.broadcast %10 : vector<1x128xf32> to vector<8x128xf32>
    %12 = arith.addf %9, %11 : vector<8x128xf32>
    %c0_11 = arith.constant 0 : index
    %c0_12 = arith.constant 0 : index
    %13 = vector.load %arg6[%c0_11, %c0_12] : memref<8x128xf32, #tpu.memory_space<vmem>>, vector<8x128xf32>
    tpu.vector_store %arg6[%c0_11, %c0_12], %12 {strides = array<i32>} : memref<8x128xf32, #tpu.memory_space<vmem>>, vector<8x128xf32>,
    return
  }
  func.func @transform_0(%arg0: i32) -> (i32, i32) {
    %c0_i32 = arith.constant 0 : i32
    %c0_i32_0 = arith.constant 0 : i32
    return %arg0, %c0_i32 : i32, i32
  }
  func.func @transform_1(%arg0: i32) -> (i32, i32) {
    %c0_i32 = arith.constant 0 : i32
    %c0_i32_0 = arith.constant 0 : i32
    %c0_i32_1 = arith.constant 0 : i32
    return %c0_i32, %c0_i32_0 : i32, i32
  }
  func.func @transform_2(%arg0: i32) -> (i32, i32) {
    %c0_i32 = arith.constant 0 : i32
    %c0_i32_0 = arith.constant 0 : i32
    %c0_i32_1 = arith.constant 0 : i32
    return %c0_i32, %c0_i32_0 : i32, i32
  }
  func.func @transform_3(%arg0: i32) -> (i32, i32) {
    %c0_i32 = arith.constant 0 : i32
    %c0_i32_0 = arith.constant 0 : i32
    %c0_i32_1 = arith.constant 0 : i32
    return %c0_i32, %c0_i32_0 : i32, i32
  }
  func.func @transform_4(%arg0: i32) -> (i32, i32) {
    %c0_i32 = arith.constant 0 : i32
    %c0_i32_0 = arith.constant 0 : i32
    %c0_i32_1 = arith.constant 0 : i32
    return %c0_i32, %c0_i32_0 : i32, i32
  }
  func.func @transform_5(%arg0: i32) -> (i32, i32) {
    %c0_i32 = arith.constant 0 : i32
    %c0_i32_0 = arith.constant 0 : i32
    return %arg0, %c0_i32 : i32, i32
  }
}

</mosaic_0001>

<bundles_post_ra>
// kernel: my_sequential.1
= control target key start
LH: loop header
LB: loop body
LE: loop exit
PB: predicated region body
PF: predicated region fallthrough
CT: control target
= control target key end

     0   :  { %vm37_vm0 = vcmask 1043456   ;;  %vm33_vm1 = vcmask 162816   ;;  %s328_s1 = inlined_call_operand.vmem [shape: f32[20,256], index: 1, kind: input, shape index: {}]   ;;  %s329_s3 = inlined_call_operand.vmem [shape: f32[256,128], index: 3, kind: input, shape index: {}]   ;;  %s330_s0 = inlined_call_operand.vmem [shape: f32[8,20], index: 0, kind: input, shape index: {}]   ;;  %s331_s4 = inlined_call_operand.vmem [shape: f32[1,128], index: 4, kind: input, shape index: {}]   ;;  %s332_s2 = inlined_call_operand.vmem [shape: f32[1,256], index: 2, kind: input, shape index: {}]   ;;  %s333_s5 = inlined_call_operand.vmem [shape: f32[8,128], index: 5, kind: output, shape index: {}]  }
   0x1   :  { %v25_v0 = vld [vmem:[%s328_s1 + $0x20] sm:$0xf]  ;;  %v23_v1 = vld [vmem:[%s328_s1 + $0x10] sm:$0xff]  ;;  %v26_v2 = vld [vmem:[%s328_s1 + $0x28] sm:$0xf] }
   0x2   :  { %167 = vmatpush.msk.msra.mxu0 %vm37_vm0, %v25_v0  ;;  %169 = vmatpush.msk.msra.mxu1 %vm37_vm0, %v26_v2  ;;  %v24_v3 = vld [vmem:[%s328_s1 + $0x18] sm:$0xff]  ;;  %v21_v4 = vld [vmem:[%s328_s1] sm:$0xff]  ;;  %v22_v5 = vld [vmem:[%s328_s1 + $0x8] sm:$0xff] }
   0x3   :  { %v101_v6 = vld [vmem:[%s329_s3 + $0x78] sm:$0xff]  ;;  %v20_v7 = vld [vmem:[%s330_s0] sm:$0xff]  ;;  %v100_v9 = vld [vmem:[%s329_s3 + $0x70] sm:$0xff] }
   0x4   :  { %58 = vmatpush.msra.mxu0 %v23_v1  ;;  %78 = vmatpush.msra.mxu1 %v24_v3  ;;  %v117_v8 = vld [vmem:[%s329_s3 + $0xf8] sm:$0xff]  ;;  %v116_v10 = vld [vmem:[%s329_s3 + $0xf0] sm:$0xff]  ;;  %v99_v11 = vld [vmem:[%s329_s3 + $0x68] sm:$0xff] }
   0x5   :  { %122 = vmatpush.msra.mxu2 %v101_v6  ;;  %142 = vmatpush.msra.mxu3 %v117_v8  ;;  %v115_v12 = vld [vmem:[%s329_s3 + $0xe8] sm:$0xff]  ;;  %v98_v13 = vld [vmem:[%s329_s3 + $0x60] sm:$0xff]  ;;  %v97_v15 = vld [vmem:[%s329_s3 + $0x58] sm:$0xff] }
   0x6   :  { %59 = vmatpush.msra.mxu0 %v21_v4  ;;  %79 = vmatpush.msra.mxu1 %v22_v5  ;;  %v114_v14 = vld [vmem:[%s329_s3 + $0xe0] sm:$0xff]  ;;  %v113_v16 = vld [vmem:[%s329_s3 + $0xd8] sm:$0xff]  ;;  %v96_v17 = vld [vmem:[%s329_s3 + $0x50] sm:$0xff] }
   0x7   :  { %168 = vmatmul.msk.f32.vlgmr.msra.gmra.mxu0 %vm33_vm1, %v20_v7  ;;  %170 = vmatmul.msk.f32.vlgmr.msra.gmra.mxu1 %vm33_vm1, %v20_v7  ;;  %v112_v18 = vld [vmem:[%s329_s3 + $0xd0] sm:$0xff]  ;;  %v95_v19 = vld [vmem:[%s329_s3 + $0x48] sm:$0xff]  ;;  %v94_v21 = vld [vmem:[%s329_s3 + $0x40] sm:$0xff] }
   0x8   :  { %123 = vmatpush.msra.mxu2 %v100_v9  ;;  %143 = vmatpush.msra.mxu3 %v116_v10  ;;  %v111_v20 = vld [vmem:[%s329_s3 + $0xc8] sm:$0xff]  ;;  %v110_v22 = vld [vmem:[%s329_s3 + $0xc0] sm:$0xff]  ;;  %v93_v23 = vld [vmem:[%s329_s3 + $0x38] sm:$0xff] }
   0x9   :  { %v109_v24 = vld [vmem:[%s329_s3 + $0xb8] sm:$0xff]  ;;  %v92_v25 = vld [vmem:[%s329_s3 + $0x30] sm:$0xff]  ;;  %v91_v27 = vld [vmem:[%s329_s3 + $0x28] sm:$0xff] }
   0xa   :  { %124 = vmatpush.msra.mxu2 %v99_v11  ;;  %144 = vmatpush.msra.mxu3 %v115_v12  ;;  %v108_v26 = vld [vmem:[%s329_s3 + $0xb0] sm:$0xff]  ;;  %v107_v28 = vld [vmem:[%s329_s3 + $0xa8] sm:$0xff]  ;;  %v90_v29 = vld [vmem:[%s329_s3 + $0x20] sm:$0xff] }
   0xb   :  { %v106_v30 = vld [vmem:[%s329_s3 + $0xa0] sm:$0xff]  ;;  %v89_v31 = vld [vmem:[%s329_s3 + $0x18] sm:$0xff]  ;;  %v88_v32 = vld [vmem:[%s329_s3 + $0x10] sm:$0xff] }
   0xc   :  { %125 = vmatpush.msra.mxu2 %v98_v13  ;;  %145 = vmatpush.msra.mxu3 %v114_v14  ;;  %v105_v33 = vld [vmem:[%s329_s3 + $0x98] sm:$0xff]  ;;  %v87_v34 = vld [vmem:[%s329_s3 + $0x8] sm:$0xff]  ;;  %v104_v35 = vld [vmem:[%s329_s3 + $0x90] sm:$0xff] }
   0xd   :  { %v86_v36 = vld [vmem:[%s329_s3] sm:$0xff]  ;;  %v103_v37 = vld [vmem:[%s329_s3 + $0x88] sm:$0xff] }
   0xe   :  { %126 = vmatpush.msra.mxu2 %v97_v15  ;;  %146 = vmatpush.msra.mxu3 %v113_v16  ;;  %v102_v38 = vld [vmem:[%s329_s3 + $0x80] sm:$0xff] }
   0xf   :  { %v27_v39 = vld [vmem:[%s332_s2] sm:$0x3] }
  0x10   :  { %127 = vmatpush.msra.mxu2 %v96_v17  ;;  %147 = vmatpush.msra.mxu3 %v112_v18  ;;  %v29_v40 = vperm.slane %v27_v39, 0  ;;  %v30_v41 = vperm.slane %v27_v39, 1  ;;  %v171_v48 = vld [vmem:[%s331_s4] ss:$0 sm:$0xff] }
  0x12   :  { %128 = vmatpush.msra.mxu2 %v95_v19  ;;  %148 = vmatpush.msra.mxu3 %v111_v20 }
  0x14   :  { %129 = vmatpush.msra.mxu2 %v94_v21  ;;  %149 = vmatpush.msra.mxu3 %v110_v22 }
  0x16   :  { %130 = vmatpush.msra.mxu2 %v93_v23  ;;  %150 = vmatpush.msra.mxu3 %v109_v24 }
  0x18   :  { %131 = vmatpush.msra.mxu2 %v92_v25  ;;  %151 = vmatpush.msra.mxu3 %v108_v26 }
  0x1a   :  { %132 = vmatpush.msra.mxu2 %v91_v27  ;;  %152 = vmatpush.msra.mxu3 %v107_v28 }
  0x1c   :  { %133 = vmatpush.msra.mxu2 %v90_v29  ;;  %153 = vmatpush.msra.mxu3 %v106_v30 }
  0x1e   :  { %134 = vmatpush.msra.mxu2 %v89_v31  ;;  %154 = vmatpush.msra.mxu3 %v105_v33 }
  0x20   :  { %135 = vmatpush.msra.mxu2 %v88_v32  ;;  %155 = vmatpush.msra.mxu3 %v104_v35 }
  0x22   :  { %136 = vmatpush.msra.mxu2 %v87_v34  ;;  %156 = vmatpush.msra.mxu3 %v103_v37 }
  0x24   :  { %137 = vmatpush.msra.mxu2 %v86_v36  ;;  %157 = vmatpush.msra.mxu3 %v102_v38 }
  0x84   :  { %v61_v42 = vpop.f32.mrf.mxu0  ;;  %v81_v43 = vpop.f32.mrf.mxu1 }
  0x85   :  { %v62_v44 = vadd.f32 %v61_v42, %v29_v40  ;;  %v82_v45 = vadd.f32 %v81_v43, %v30_v41 }
  0x87   :  { %v84_v46 = vmax.f32 %v62_v44, 0.0  ;;  %v85_v47 = vmax.f32 %v82_v45, 0.0 }
  0x89   :  { %138 = vmatmul.f32.vlgmr.msra.gmra.mxu2 %v84_v46  ;;  %158 = vmatmul.f32.vlgmr.msra.gmra.mxu3 %v85_v47 }
 0x10c   :  { %v139_v49 = vpop.f32.mrf.mxu2  ;;  %v159_v50 = vpop.f32.mrf.mxu3 }
 0x10d   :  { %v140_v51 = vadd.f32 %v171_v48, %v139_v49 }
 0x10f   :  { %v160_v52 = vadd.f32 %v159_v50, %v140_v51 }
 0x111   :  { %162 = vst [vmem:[%s333_s5] sm:$0xff] %v160_v52 }

</bundles_post_ra>
